<compile_context>
chip_gen: v7x
topology: tpu7x:2x2x1
jax: 0.10.0
libtpu: 0.0.40
codegen_flags: <defaults>
</compile_context>

<pallas_src>
import jax
import jax.numpy as jnp
from jax.experimental import pallas as pl
from jax.experimental.pallas import tpu as pltpu

LANE = 128
NEG_INF = -1e30


def _round_up(x, m):
    return ((x + m - 1) // m) * m


def _pad2(a, rows, cols, val=0.0):
    return jnp.pad(a, ((0, rows - a.shape[0]), (0, cols - a.shape[1])),
                   constant_values=val)


# --------------- kernel A: hW = relu(x @ W1 + b1) @ W2  (row-tiled) ---------------
def feat_kernel(x_ref, w1_ref, b1_ref, w2_ref, hw_ref):
    h = jnp.dot(x_ref[...], w1_ref[...], preferred_element_type=jnp.float32)
    h = jnp.maximum(h + b1_ref[...], 0.0)                       # f32 VPU path
    # TODO(synk): dropout(p=0.5) is identity in eval mode; training-mode dropout
    # would use pltpu.prng_seed / pltpu.stateful_bernoulli here.
    hw = jnp.dot(h.astype(jnp.bfloat16), w2_ref[...],
                 preferred_element_type=jnp.float32)
    hw_ref[...] = hw.astype(hw_ref.dtype)


# ------ kernel B: out = log_softmax(relu(A_hat @ hW + b2) @ W3 + b3)  (tiled spmm) ------
def make_spmm_kernel(tk, resident_hw):
    def spmm_kernel(a_ref, hw_ref, b2_ref, w3_ref, b3_ref, out_ref, acc_ref):
        k = pl.program_id(1)

        @pl.when(k == 0)
        def _():
            acc_ref[...] = jnp.zeros_like(acc_ref)

        if resident_hw:
            # hw_ref holds the full (n_k_pad, h_pad) slab resident in VMEM;
            # slice the k-th row block (static size, aligned start).
            start = pl.multiple_of(k * tk, tk)
            hw_tile = hw_ref[pl.ds(start, tk), :]
        else:
            hw_tile = hw_ref[...]

        # inner reduction loop is MXU-only; epilogue work is gated to the last step
        acc_ref[...] += jnp.dot(a_ref[...], hw_tile,
                                preferred_element_type=jnp.float32)

        @pl.when(k == pl.num_programs(1) - 1)
        def _():
            h = jnp.maximum(acc_ref[...] + b2_ref[...], 0.0)        # f32
            logits = jnp.dot(h.astype(jnp.bfloat16), w3_ref[...],
                             preferred_element_type=jnp.float32) + b3_ref[...]
            # numerically-stable log_softmax; padded class cols carry -1e30 bias
            m = jnp.max(logits, axis=-1, keepdims=True)
            z = logits - m
            lse = jnp.log(jnp.sum(jnp.exp(z), axis=-1, keepdims=True))
            out_ref[...] = z - lse

    return spmm_kernel


def gcn_forward(x, a_hat, params, *, tm=512, tk=2048,
                resident_hw_budget=16 * 1024 * 1024):
    """Two pallas_calls: feature transform (row-tiled) + tiled A_hat spmm."""
    (w1, b1), (w2, b2), (w3, b3) = params
    n, f = x.shape
    hidden = w1.shape[1]
    num_class = w3.shape[1]

    # Effective tiles, clamped to the padded problem size so tiny graphs do not
    # get blown up to 2048-wide tiles while large graphs get 2 MiB A_hat tiles.
    tm_eff = min(tm, _round_up(n, 8))          # row tile of A_hat / output
    tk_eff = min(tk, _round_up(n, LANE))       # col tile of A_hat / row tile of hW
    # Kernel-A row tile: equal to tk_eff, which always divides n_k_pad below.
    tma_eff = tk_eff

    f_pad = _round_up(f, LANE)
    h_pad = _round_up(hidden, LANE)
    c_pad = _round_up(num_class, LANE)
    n_m_pad = _round_up(n, tm_eff)             # rows of A_hat and output
    n_k_pad = _round_up(n, tk_eff)             # cols of A_hat, rows of x / hW

    assert n_m_pad % tm_eff == 0
    assert n_k_pad % tk_eff == 0
    assert n_k_pad % tma_eff == 0

    # bf16 MXU operands (f32 accumulation inside the kernels); biases stay f32.
    x_p = _pad2(x, n_k_pad, f_pad).astype(jnp.bfloat16)
    a_p = _pad2(a_hat, n_m_pad, n_k_pad).astype(jnp.bfloat16)
    w1_p = _pad2(w1, f_pad, h_pad).astype(jnp.bfloat16)
    w2_p = _pad2(w2, h_pad, h_pad).astype(jnp.bfloat16)
    w3_p = _pad2(w3, h_pad, c_pad).astype(jnp.bfloat16)
    b1_p = _pad2(b1, 1, h_pad).astype(jnp.float32)
    b2_p = _pad2(b2, 1, h_pad).astype(jnp.float32)
    b3_p = _pad2(b3, 1, c_pad, val=NEG_INF).astype(jnp.float32)  # mask padded classes

    # 32 MiB scoped VMEM is safe on v5e/v6e/v7x; worst-case resident plan is
    # ~16 MiB (hW, 2 bufs) + 4 MiB (2x A tile) + ~1 MiB (acc/out/weights).
    vmem_limit = 32 * 1024 * 1024

    hw = pl.pallas_call(
        feat_kernel,
        out_shape=jax.ShapeDtypeStruct((n_k_pad, h_pad), jnp.bfloat16),
        grid=(n_k_pad // tma_eff,),
        in_specs=[
            pl.BlockSpec((tma_eff, f_pad), lambda i: (i, 0)),
            pl.BlockSpec((f_pad, h_pad), lambda i: (0, 0)),
            pl.BlockSpec((1, h_pad), lambda i: (0, 0)),
            pl.BlockSpec((h_pad, h_pad), lambda i: (0, 0)),
        ],
        out_specs=pl.BlockSpec((tma_eff, h_pad), lambda i: (i, 0)),
        compiler_params=pltpu.CompilerParams(
            dimension_semantics=("parallel",),
            vmem_limit_bytes=vmem_limit,
        ),
    )(x_p, w1_p, b1_p, w2_p)

    # Resident hW: full block with a constant index_map -> DMA'd once, never
    # re-streamed per row block (kills the ~N/tm x re-read amplification).
    # Budget counts the 2 pipeline buffers; fall back to streaming slabs if big.
    resident_hw = (2 * n_k_pad * h_pad * 2) <= resident_hw_budget
    if resident_hw:
        hw_spec = pl.BlockSpec((n_k_pad, h_pad), lambda i, k: (0, 0))
    else:
        hw_spec = pl.BlockSpec((tk_eff, h_pad), lambda i, k: (k, 0))

    out = pl.pallas_call(
        make_spmm_kernel(tk_eff, resident_hw),
        out_shape=jax.ShapeDtypeStruct((n_m_pad, c_pad), jnp.float32),
        grid=(n_m_pad // tm_eff, n_k_pad // tk_eff),   # reduction (k) axis last
        in_specs=[
            pl.BlockSpec((tm_eff, tk_eff), lambda i, k: (i, k)),    # A_hat tile
            hw_spec,                                                # hW (resident or slab)
            pl.BlockSpec((1, h_pad), lambda i, k: (0, 0)),          # b2
            pl.BlockSpec((h_pad, c_pad), lambda i, k: (0, 0)),      # W3
            pl.BlockSpec((1, c_pad), lambda i, k: (0, 0)),          # b3 (+mask)
        ],
        out_specs=pl.BlockSpec((tm_eff, c_pad), lambda i, k: (i, 0)),
        scratch_shapes=[pltpu.VMEM((tm_eff, h_pad), jnp.float32)],
        compiler_params=pltpu.CompilerParams(
            dimension_semantics=("parallel", "arbitrary"),
            vmem_limit_bytes=vmem_limit,
        ),
    )(a_p, hw, b2_p, w3_p, b3_p)

    return out[:n, :num_class]


# ------------------------------ plain-JAX glue ------------------------------
def build_norm_adj(edge_index, edge_weight, num_nodes):
    """Dense D^{-1/2}(A + I)D^{-1/2}, matching PyG gcn_norm."""
    # TODO(synk): for large sparse graphs this should become a CSR scalar-prefetch
    # gather kernel instead of a dense N x N matrix.
    src = edge_index[0]
    dst = edge_index[1]
    a = jnp.zeros((num_nodes, num_nodes), jnp.float32)
    a = a.at[dst, src].add(edge_weight)
    a = a + jnp.eye(num_nodes, dtype=jnp.float32)
    deg = jnp.sum(a, axis=1)
    dinv = jnp.where(deg > 0.0, 1.0 / jnp.sqrt(deg), 0.0)
    return dinv[:, None] * a * dinv[None, :]


def init_params(key, features_num, hidden, num_class):
    k1, k2, k3, k4, k5, k6 = jax.random.split(key, 6)

    def glorot(k, fan_in, fan_out):
        lim = (6.0 / (fan_in + fan_out)) ** 0.5
        return jax.random.uniform(k, (fan_in, fan_out), jnp.float32, -lim, lim)

    w1 = glorot(k1, features_num, hidden)               # first_lin
    b1 = jax.random.uniform(k2, (1, hidden), jnp.float32, -0.1, 0.1)
    w2 = glorot(k3, hidden, hidden)                     # convs[0] (GCNConv)
    b2 = jax.random.uniform(k4, (1, hidden), jnp.float32, -0.1, 0.1)
    w3 = glorot(k5, hidden, num_class)                  # lin2
    b3 = jax.random.uniform(k6, (1, num_class), jnp.float32, -0.1, 0.1)
    return [(w1, b1), (w2, b2), (w3, b3)]


def gcn_reference(x, a_hat, params):
    (w1, b1), (w2, b2), (w3, b3) = params
    h = jax.nn.relu(x @ w1 + b1)
    h = jax.nn.relu(a_hat @ (h @ w2) + b2)
    logits = h @ w3 + b3
    return jax.nn.log_softmax(logits, axis=-1)


if __name__ == "__main__":
    num_nodes = 8
    features_num = 16
    hidden = 16
    num_class = 2
    num_edges = 20

    key = jax.random.PRNGKey(0)
    kx, ke_src, ke_dst, kw, kp = jax.random.split(key, 5)

    x = jax.random.normal(kx, (num_nodes, features_num), jnp.float32)
    src = jax.random.randint(ke_src, (num_edges,), 0, num_nodes)
    dst = (src + 1 + jax.random.randint(ke_dst, (num_edges,), 0, num_nodes - 1)) % num_nodes
    edge_index = jnp.stack([src, dst], axis=0)           # no self loops by construction
    edge_weight = jax.random.uniform(kw, (num_edges,), jnp.float32, 0.5, 1.5)

    a_hat = build_norm_adj(edge_index, edge_weight, num_nodes)
    params = init_params(kp, features_num, hidden, num_class)

    out = gcn_forward(x, a_hat, params)
    out = jax.block_until_ready(out)

    # sanity: shape, log_softmax rows sum to 1 in prob space, matches f32 reference
    assert out.shape == (num_nodes, num_class)
    assert jnp.allclose(jnp.sum(jnp.exp(out), axis=-1), 1.0, atol=1e-3)
    ref = gcn_reference(x, a_hat, params)
    assert jnp.allclose(out, ref, atol=0.15), float(jnp.max(jnp.abs(out - ref)))

    print("KERNEL_OK")
</pallas_src>

<mosaic_0001>
module attributes {stable_mosaic.version = 11 : i64} {
  func.func @feat_kernel(%arg0: i32, %arg1: memref<128x128xbf16, #tpu.memory_space<vmem>>, %arg2: memref<128x128xbf16, #tpu.memory_space<vmem>>, %arg3: memref<1x128xf32, #tpu.memory_space<vmem>>, %arg4: memref<128x128xbf16, #tpu.memory_space<vmem>>, %arg5: memref<128x128xbf16, #tpu.memory_space<vmem>>) attributes {dimension_semantics = [#tpu.dimension_semantics<parallel>], iteration_bounds = array<i64: 1>, scalar_prefetch = 0 : i64, scratch_operands = 0 : i64, tpu.core_type = #tpu.core_type<tc>, window_params = [{transform_indices = @transform_0, window_bounds = array<i64: 128, 128>}, {pipeline_mode = #tpu.pipeline_mode<synchronous>, transform_indices = @transform_1, window_bounds = array<i64: 128, 128>}, {pipeline_mode = #tpu.pipeline_mode<synchronous>, transform_indices = @transform_2, window_bounds = array<i64: 1, 128>}, {pipeline_mode = #tpu.pipeline_mode<synchronous>, transform_indices = @transform_3, window_bounds = array<i64: 128, 128>}, {transform_indices = @transform_4, window_bounds = array<i64: 128, 128>}]} {
    %c0 = arith.constant 0 : index
    %c0_0 = arith.constant 0 : index
    %0 = vector.load %arg1[%c0, %c0_0] : memref<128x128xbf16, #tpu.memory_space<vmem>>, vector<128x128xbf16>
    %c0_1 = arith.constant 0 : index
    %c0_2 = arith.constant 0 : index
    %1 = vector.load %arg2[%c0_1, %c0_2] : memref<128x128xbf16, #tpu.memory_space<vmem>>, vector<128x128xbf16>
    %cst = arith.constant dense<0.000000e+00> : vector<128x128xf32>
    %2 = tpu.matmul %0, %1, %cst {dimension_numbers = #tpu.dot_dimension_numbers<[1], [0], [0], [1], [0, 0, 1, 1], [], []>} : vector<128x128xbf16>, vector<128x128xbf16>, vector<128x128xf32> -> vector<128x128xf32>
    %c0_3 = arith.constant 0 : index
    %c0_4 = arith.constant 0 : index
    %3 = vector.load %arg3[%c0_3, %c0_4] : memref<1x128xf32, #tpu.memory_space<vmem>>, vector<1x128xf32>
    %4 = vector.broadcast %3 : vector<1x128xf32> to vector<128x128xf32>
    %5 = arith.addf %2, %4 : vector<128x128xf32>
    %cst_5 = arith.constant 0.000000e+00 : f32
    %6 = vector.broadcast %cst_5 : f32 to vector<128x128xf32>
    %7 = arith.maximumf %5, %6 : vector<128x128xf32>
    %8 = arith.truncf %7 : vector<128x128xf32> to vector<128x128xbf16>
    %c0_6 = arith.constant 0 : index
    %c0_7 = arith.constant 0 : index
    %9 = vector.load %arg4[%c0_6, %c0_7] : memref<128x128xbf16, #tpu.memory_space<vmem>>, vector<128x128xbf16>
    %cst_8 = arith.constant dense<0.000000e+00> : vector<128x128xf32>
    %10 = tpu.matmul %8, %9, %cst_8 {dimension_numbers = #tpu.dot_dimension_numbers<[1], [0], [0], [1], [0, 0, 1, 1], [], []>} : vector<128x128xbf16>, vector<128x128xbf16>, vector<128x128xf32> -> vector<128x128xf32>
    %11 = arith.truncf %10 : vector<128x128xf32> to vector<128x128xbf16>
    %c0_9 = arith.constant 0 : index
    %c0_10 = arith.constant 0 : index
    %12 = vector.load %arg5[%c0_9, %c0_10] : memref<128x128xbf16, #tpu.memory_space<vmem>>, vector<128x128xbf16>
    tpu.vector_store %arg5[%c0_9, %c0_10], %11 {strides = array<i32>} : memref<128x128xbf16, #tpu.memory_space<vmem>>, vector<128x128xbf16>,
    return
  }
  func.func @transform_0(%arg0: i32) -> (i32, i32) {
    %c0_i32 = arith.constant 0 : i32
    %c0_i32_0 = arith.constant 0 : i32
    return %arg0, %c0_i32 : i32, i32
  }
  func.func @transform_1(%arg0: i32) -> (i32, i32) {
    %c0_i32 = arith.constant 0 : i32
    %c0_i32_0 = arith.constant 0 : i32
    %c0_i32_1 = arith.constant 0 : i32
    return %c0_i32, %c0_i32_0 : i32, i32
  }
  func.func @transform_2(%arg0: i32) -> (i32, i32) {
    %c0_i32 = arith.constant 0 : i32
    %c0_i32_0 = arith.constant 0 : i32
    %c0_i32_1 = arith.constant 0 : i32
    return %c0_i32, %c0_i32_0 : i32, i32
  }
  func.func @transform_3(%arg0: i32) -> (i32, i32) {
    %c0_i32 = arith.constant 0 : i32
    %c0_i32_0 = arith.constant 0 : i32
    %c0_i32_1 = arith.constant 0 : i32
    return %c0_i32, %c0_i32_0 : i32, i32
  }
  func.func @transform_4(%arg0: i32) -> (i32, i32) {
    %c0_i32 = arith.constant 0 : i32
    %c0_i32_0 = arith.constant 0 : i32
    return %arg0, %c0_i32 : i32, i32
  }
}

</mosaic_0001>

<bundles_post_ra>
// kernel: tpu_custom_call.1
= control target key start
LH: loop header
LB: loop body
LE: loop exit
PB: predicated region body
PF: predicated region fallthrough
CT: control target
= control target key end

     0   :  { %9 = vsyncpa [#allocation3], 0  ;;  %s1000_s0 = inlined_call_operand.hbm [shape: bf16[128,128], index: 0, kind: input, shape index: {}]   ;;  %s1001_s1 = inlined_call_operand.hbm [shape: bf16[128,128], index: 1, kind: input, shape index: {}]   ;;  %s1002_s2 = inlined_call_operand.vmem [shape: f32[1,128], index: 2, kind: input, shape index: {}]   ;;  %s1003_s3 = inlined_call_operand.hbm [shape: bf16[128,128], index: 3, kind: input, shape index: {}]   ;;  %s1004_s4 = inlined_call_operand.hbm [shape: bf16[128,128], index: 4, kind: output, shape index: {}]  }
   0x1   :  { %10 = vsyncpa [#allocation6], 0 }
   0x2   :  { %11 = vsyncpa [#allocation4], 0  ;;  %s899_s15 = smov [#allocation5]   ;;  %s900_s17 = smov [#allocation2]  }
   0x3   :  { %s29_s16 = sshll.u32 %s899_s15, 4  ;;  %s17_s18 = sshll.u32 %s900_s17, 4  ;;  %s30_s16 = int_to_ptr.vmem [resolvable:$true] %s29_s16  ;;  %s930_s18 = int_to_ptr.vmem [resolvable:$true] %s17_s18 }
   0x4   :  { %s805_s21 = scalar_lea.hbm %s1001_s1, 1024 }
   0x5   :  { %p806_p0 = scmp.ne.s32.totalorder %s1001_s1, %s805_s21  ;;  %p809_p1 = scmp.lt.u32.totalorder %s805_s21, %s1001_s1 }
   0x7   :  { %p811_p2 = pnand %p809_p1, %p806_p0 }
   0x9   :  { %814 = shalt.err (!%p811_p2)
}
   0xa   :  { %s815_s26 = scalar_lea.vmem %s30_s16, 1024  ;;  %p820_p4 = scmp.lt.s32.totalorder %s30_s16, %s30_s16 }
   0xb   :  { %p816_p3 = scmp.ne.s32.totalorder %s30_s16, %s815_s26  ;;  %p821_p5 = scmp.lt.s32.totalorder %s815_s26, %s815_s26 }
   0xd   :  { %p822_p6 = por %p821_p5, %p820_p4 }
   0xf   :  { %p823_p7 = pnand %p822_p6, %p816_p3 }
  0x11   :  { %826 = shalt.err (!%p823_p7)
}
  0x12   :  { %s901_s27 = smov 64   ;;  %s902_s28 = smov 4  }
  0x13   :  { %35 = dma.hbm_to_vmem [thread:$0]  %s1001_s1, 1024, %s30_s16, [#allocation6], %s901_s27, %s901_s27, %s902_s28  }
  0x14   :  { %s827_s7 = scalar_lea.hbm %s1000_s0, 1024 }
  0x15   :  { %p828_p8 = scmp.ne.s32.totalorder %s1000_s0, %s827_s7  ;;  %p831_p9 = scmp.lt.u32.totalorder %s827_s7, %s1000_s0 }
  0x17   :  { %p833_p10 = pnand %p831_p9, %p828_p8 }
  0x19   :  { %836 = shalt.err (!%p833_p10)
}
  0x1a   :  { %s837_s12 = scalar_lea.vmem %s930_s18, 1024  ;;  %p842_p12 = scmp.lt.s32.totalorder %s930_s18, %s930_s18 }
  0x1b   :  { %p838_p11 = scmp.ne.s32.totalorder %s930_s18, %s837_s12  ;;  %p843_p13 = scmp.lt.s32.totalorder %s837_s12, %s837_s12 }
  0x1d   :  { %p844_p0 = por %p843_p13, %p842_p12 }
  0x1f   :  { %p845_p1 = pnand %p844_p0, %p838_p11 }
  0x21   :  { %848 = shalt.err (!%p845_p1)
}
  0x22   :  { %23 = dma.hbm_to_vmem [thread:$0]  %s1000_s0, 1024, %s930_s18, [#allocation3], %s901_s27, %s901_s27, %s902_s28  }
  0x23   :  { %s903_s14 = smov [#allocation7]   ;;  %s849_s19 = scalar_lea.hbm %s1003_s3, 1024 }
  0x24   :  { %s43_s15 = sshll.u32 %s903_s14, 4  ;;  %p850_p2 = scmp.ne.s32.totalorder %s1003_s3, %s849_s19  ;;  %s44_s15 = int_to_ptr.vmem [resolvable:$true] %s43_s15 }
  0x25   :  { %p853_p3 = scmp.lt.u32.totalorder %s849_s19, %s1003_s3 }
  0x27   :  { %p855_p4 = pnand %p853_p3, %p850_p2 }
  0x29   :  { %858 = shalt.err (!%p855_p4)
}
  0x2a   :  { %s859_s24 = scalar_lea.vmem %s44_s15, 1024  ;;  %p864_p6 = scmp.lt.s32.totalorder %s44_s15, %s44_s15 }
  0x2b   :  { %p860_p5 = scmp.ne.s32.totalorder %s44_s15, %s859_s24  ;;  %p865_p7 = scmp.lt.s32.totalorder %s859_s24, %s859_s24 }
  0x2d   :  { %p866_p8 = por %p865_p7, %p864_p6 }
  0x2f   :  { %p867_p9 = pnand %p866_p8, %p860_p5 }
  0x31   :  { %870 = shalt.err (!%p867_p9)
}
  0x32   :  { %49 = dma.hbm_to_vmem [thread:$0]  %s1003_s3, 1024, %s44_s15, [#allocation6], %s901_s27, %s901_s27, %s902_s28  }
  0x33   :  { %893 = dma.done.wait [#allocation3], 1024  }
  0x34   :  { %894 = vsyncadd [#allocation3], 4294966272 }
  0x35   :  { %895 = dma.done.wait [#allocation6], 2048  }
  0x36   :  { %896 = vsyncadd [#allocation6], 4294965248  ;;  %v781_v0 = vld [vmem:[#allocation5] sm:$0xff]   ;;  %v782_v1 = vld [vmem:[#allocation5 + $0x8] sm:$0xff]  }
  0x37   :  { %711 = vmatprep.subr.bf16.mxu0 %v781_v0  ;;  %v783_v2 = vld [vmem:[#allocation5 + $0x10] sm:$0xff]   ;;  %v784_v3 = vld [vmem:[#allocation5 + $0x18] sm:$0xff]   ;;  %v789_v4 = vld [vmem:[#allocation2] sm:$0xff]  }
  0x38   :  { %712 = vmatpush3.bf16.msra.mxu0 %v781_v0  ;;  %727 = vmatprep.mubr.bf16.mxu0 %v789_v4  ;;  %v785_v5 = vld [vmem:[#allocation5 + $0x20] sm:$0xff]   ;;  %v786_v6 = vld [vmem:[#allocation5 + $0x28] sm:$0xff]   ;;  %v787_v9 = vld [vmem:[#allocation5 + $0x30] sm:$0xff]  }
  0x39   :  { %713 = vmatprep.subr.bf16.mxu0 %v782_v1  ;;  %v797_v7 = vld [vmem:[#allocation7] sm:$0xff]   ;;  %v798_v8 = vld [vmem:[#allocation7 + $0x8] sm:$0xff]   ;;  %v799_v10 = vld [vmem:[#allocation7 + $0x10] sm:$0xff]  }
  0x3a   :  { %743 = vmatprep.subr.bf16.mxu1 %v797_v7  ;;  %v788_v11 = vld [vmem:[#allocation5 + $0x38] sm:$0xff]   ;;  %v801_v13 = vld [vmem:[#allocation7 + $0x20] sm:$0xff]   ;;  %v790_v14 = vld [vmem:[#allocation2 + $0x8] sm:$0xff]  }
  0x3b   :  { %744 = vmatpush3.bf16.msra.mxu1 %v797_v7  ;;  %v800_v12 = vld [vmem:[#allocation7 + $0x18] sm:$0xff]   ;;  %v791_v15 = vld [vmem:[#allocation2 + $0x10] sm:$0xff]   ;;  %v802_v16 = vld [vmem:[#allocation7 + $0x28] sm:$0xff]  }
  0x3c   :  { %714 = vmatpush3.bf16.msra.mxu0 %v782_v1  ;;  %745 = vmatprep.subr.bf16.mxu1 %v798_v8  ;;  %v792_v17 = vld [vmem:[#allocation2 + $0x18] sm:$0xff]   ;;  %v793_v18 = vld [vmem:[#allocation2 + $0x20] sm:$0xff]   ;;  %v794_v19 = vld [vmem:[#allocation2 + $0x28] sm:$0xff]  }
  0x3d   :  { %715 = vmatprep.subr.bf16.mxu0 %v783_v2  ;;  %v795_v20 = vld [vmem:[#allocation2 + $0x30] sm:$0xff]   ;;  %v796_v21 = vld [vmem:[#allocation2 + $0x38] sm:$0xff]   ;;  %v575_v24 = vld [vmem:[%s1002_s2] ss:$0 sm:$0xff]  ;;  %s904_s2 = smov [#allocation8]  }
  0x3e   :  { %v803_v22 = vld [vmem:[#allocation7 + $0x30] sm:$0xff]   ;;  %v804_v23 = vld [vmem:[#allocation7 + $0x38] sm:$0xff]   ;;  %s562_s26 = sshll.u32 %s904_s2, 4  ;;  %s563_s26 = int_to_ptr.vmem [resolvable:$true] %s562_s26 }
  0x3f   :  { %746 = vmatpush3.bf16.msra.mxu1 %v798_v8  ;;  %s871_s29 = scalar_lea.vmem %s563_s26, 1024  ;;  %p876_p11 = scmp.lt.s32.totalorder %s563_s26, %s563_s26 }
  0x40   :  { %716 = vmatpush3.bf16.msra.mxu0 %v783_v2  ;;  %747 = vmatprep.subr.bf16.mxu1 %v799_v10  ;;  %p872_p10 = scmp.ne.s32.totalorder %s563_s26, %s871_s29  ;;  %p877_p12 = scmp.lt.s32.totalorder %s871_s29, %s871_s29 }
  0x41   :  { %717 = vmatprep.subr.bf16.mxu0 %v784_v3 }
  0x42   :  { %p878_p13 = por %p877_p12, %p876_p11 }
  0x43   :  { %748 = vmatpush3.bf16.msra.mxu1 %v799_v10 }
  0x44   :  { %718 = vmatpush3.bf16.msra.mxu0 %v784_v3  ;;  %749 = vmatprep.subr.bf16.mxu1 %v800_v12  ;;  %p879_p0 = pnand %p878_p13, %p872_p10 }
  0x45   :  { %719 = vmatprep.subr.bf16.mxu0 %v785_v5 }
  0x47   :  { %750 = vmatpush3.bf16.msra.mxu1 %v800_v12 }
  0x48   :  { %720 = vmatpush3.bf16.msra.mxu0 %v785_v5  ;;  %751 = vmatprep.subr.bf16.mxu1 %v801_v13 }
  0x49   :  { %721 = vmatprep.subr.bf16.mxu0 %v786_v6 }
  0x4b   :  { %752 = vmatpush3.bf16.msra.mxu1 %v801_v13 }
  0x4c   :  { %722 = vmatpush3.bf16.msra.mxu0 %v786_v6  ;;  %753 = vmatprep.subr.bf16.mxu1 %v802_v16 }
  0x4d   :  { %723 = vmatprep.subr.bf16.mxu0 %v787_v9 }
  0x4f   :  { %754 = vmatpush3.bf16.msra.mxu1 %v802_v16 }
  0x50   :  { %724 = vmatpush3.bf16.msra.mxu0 %v787_v9  ;;  %755 = vmatprep.subr.bf16.mxu1 %v803_v22 }
  0x51   :  { %725 = vmatprep.subr.bf16.mxu0 %v788_v11 }
  0x53   :  { %756 = vmatpush3.bf16.msra.mxu1 %v803_v22 }
  0x54   :  { %726 = vmatpush3.bf16.msra.mxu0 %v788_v11  ;;  %757 = vmatprep.subr.bf16.mxu1 %v804_v23 }
  0x57   :  { %728 = vmatmul.mubr.bf16.vlgmr.msra.gmra.mrb[0].mxu0 %v790_v14  ;;  %758 = vmatpush3.bf16.msra.mxu1 %v804_v23 }
  0x58   :  { %731 = vmatprep.mubr.bf16.mxu0 %v791_v15 }
  0x5f   :  { %732 = vmatmul.mubr.bf16.gmra.mrb[4].mxu0 %v792_v17 }
  0x60   :  { %735 = vmatprep.mubr.bf16.mxu0 %v793_v18 }
  0x67   :  { %736 = vmatmul.mubr.bf16.gmra.mrb[8].mxu0 %v794_v19 }
  0x68   :  { %739 = vmatprep.mubr.bf16.mxu0 %v795_v20 }
  0x6f   :  { %740 = vmatmul.mubr.bf16.gmra.mrb[12].mxu0 %v796_v21 }
 0x12a   :  { %v729_v25 = vpop.f32.mrb[0].mxu0 }
 0x12b   :  { %v238_v26 = vadd.f32 %v729_v25, %v575_v24  ;;  %v229_v27 = vpop.f32.mrb[1].mxu0 }
 0x12c   :  { %v230_v28 = vadd.f32 %v575_v24, %v229_v27  ;;  %v730_v29 = vpop.f32.mrb[2].mxu0 }
 0x12d   :  { %v241_v30 = vadd.f32 %v730_v29, %v575_v24  ;;  %v232_v31 = vpop.f32.mrb[3].mxu0  ;;  %v294_v33 = vmax.f32 %v238_v26, 0.0 }
 0x12e   :  { %v233_v32 = vadd.f32 %v575_v24, %v232_v31  ;;  %v292_v35 = vmax.f32 %v230_v28, 0.0 }
 0x12f   :  { %v295_v34 = vmax.f32 %v241_v30, 0.0 }
 0x130   :  { %v293_v36 = vmax.f32 %v233_v32, 0.0 }
 0x131   :  { %v309_v37 = vpack.c.bf16 %v295_v34, %v294_v33 }
 0x132   :  { %v733_v38 = vpop.f32.mrb[4].mxu0  ;;  %v308_v39 = vpack.c.bf16 %v293_v36, %v292_v35 }
 0x133   :  { %v254_v40 = vadd.f32 %v733_v38, %v575_v24  ;;  %v245_v41 = vpop.f32.mrb[5].mxu0 }
 0x134   :  { %v246_v42 = vadd.f32 %v575_v24, %v245_v41  ;;  %v734_v43 = vpop.f32.mrb[6].mxu0  ;;  %759 = vmatprep.mubr.bf16.mxu1 %v308_v39 }
 0x135   :  { %v257_v44 = vadd.f32 %v734_v43, %v575_v24  ;;  %v248_v45 = vpop.f32.mrb[7].mxu0  ;;  %760 = vmatmul.mubr.bf16.vlgmr.msra.gmra.mrb[0].mxu1 %v309_v37  ;;  %v298_v47 = vmax.f32 %v254_v40, 0.0 }
 0x136   :  { %v249_v46 = vadd.f32 %v575_v24, %v248_v45  ;;  %v296_v49 = vmax.f32 %v246_v42, 0.0 }
 0x137   :  { %v299_v48 = vmax.f32 %v257_v44, 0.0 }
 0x138   :  { %v297_v50 = vmax.f32 %v249_v46, 0.0 }
 0x139   :  { %v311_v51 = vpack.c.bf16 %v299_v48, %v298_v47 }
 0x13a   :  { %v310_v52 = vpack.c.bf16 %v297_v50, %v296_v49  ;;  %v737_v53 = vpop.f32.mrb[8].mxu0 }
 0x13b   :  { %v270_v54 = vadd.f32 %v737_v53, %v575_v24  ;;  %v261_v55 = vpop.f32.mrb[9].mxu0 }
 0x13c   :  { %v262_v56 = vadd.f32 %v575_v24, %v261_v55  ;;  %v738_v57 = vpop.f32.mrb[10].mxu0  ;;  %763 = vmatprep.mubr.bf16.mxu1 %v310_v52 }
 0x13d   :  { %v273_v58 = vadd.f32 %v738_v57, %v575_v24  ;;  %v264_v59 = vpop.f32.mrb[11].mxu0  ;;  %764 = vmatmul.mubr.bf16.gmra.mrb[4].mxu1 %v311_v51  ;;  %v302_v61 = vmax.f32 %v270_v54, 0.0 }
 0x13e   :  { %v265_v60 = vadd.f32 %v575_v24, %v264_v59  ;;  %v300_v63 = vmax.f32 %v262_v56, 0.0 }
 0x13f   :  { %v303_v62 = vmax.f32 %v273_v58, 0.0 }
 0x140   :  { %v301_v0 = vmax.f32 %v265_v60, 0.0 }
 0x141   :  { %v313_v1 = vpack.c.bf16 %v303_v62, %v302_v61 }
 0x142   :  { %v312_v2 = vpack.c.bf16 %v301_v0, %v300_v63  ;;  %v741_v3 = vpop.f32.mrb[12].mxu0 }
 0x143   :  { %v286_v4 = vadd.f32 %v741_v3, %v575_v24  ;;  %v277_v5 = vpop.f32.mrb[13].mxu0 }
 0x144   :  { %v278_v6 = vadd.f32 %v575_v24, %v277_v5  ;;  %v742_v7 = vpop.f32.mrb[14].mxu0  ;;  %767 = vmatprep.mubr.bf16.mxu1 %v312_v2 }
 0x145   :  { %v289_v8 = vadd.f32 %v742_v7, %v575_v24  ;;  %v280_v9 = vpop.f32.mrb[15].mxu0  ;;  %768 = vmatmul.mubr.bf16.gmra.mrb[8].mxu1 %v313_v1  ;;  %v306_v11 = vmax.f32 %v286_v4, 0.0 }
 0x146   :  { %v281_v10 = vadd.f32 %v575_v24, %v280_v9  ;;  %v304_v13 = vmax.f32 %v278_v6, 0.0 }
 0x147   :  { %v307_v12 = vmax.f32 %v289_v8, 0.0 }
 0x148   :  { %v305_v14 = vmax.f32 %v281_v10, 0.0 }
 0x149   :  { %v315_v15 = vpack.c.bf16 %v307_v12, %v306_v11 }
 0x14a   :  { %v314_v16 = vpack.c.bf16 %v305_v14, %v304_v13 }
 0x14c   :  { %771 = vmatprep.mubr.bf16.mxu1 %v314_v16 }
 0x14d   :  { %772 = vmatmul.mubr.bf16.gmra.mrb[12].mxu1 %v315_v15 }
 0x208   :  { %v761_v17 = vpop.f32.mrb[0].mxu1 }
 0x209   :  { %v414_v18 = vpop.f32.mrb[1].mxu1 }
 0x20a   :  { %v762_v19 = vpop.f32.mrb[2].mxu1 }
 0x20b   :  { %v640_v20 = vpack.c.bf16 %v762_v19, %v761_v17  ;;  %v417_v21 = vpop.f32.mrb[3].mxu1 }
 0x20c   :  { %v635_v22 = vpack.c.bf16 %v417_v21, %v414_v18 }
 0x20d   :  { %672 = vst [vmem:[#allocation8 + $0x8] sm:$0xff] %v640_v20  }
 0x20e   :  { %636 = vst [vmem:[#allocation8] sm:$0xff] %v635_v22  }
 0x210   :  { %v765_v23 = vpop.f32.mrb[4].mxu1 }
 0x211   :  { %v430_v25 = vpop.f32.mrb[5].mxu1 }
 0x212   :  { %v766_v26 = vpop.f32.mrb[6].mxu1 }
 0x213   :  { %v650_v24 = vpack.c.bf16 %v766_v26, %v765_v23  ;;  %v433_v27 = vpop.f32.mrb[7].mxu1 }
 0x214   :  { %v645_v28 = vpack.c.bf16 %v433_v27, %v430_v25 }
 0x215   :  { %674 = vst [vmem:[#allocation8 + $0x18] sm:$0xff] %v650_v24  }
 0x216   :  { %673 = vst [vmem:[#allocation8 + $0x10] sm:$0xff] %v645_v28  }
 0x218   :  { %v769_v29 = vpop.f32.mrb[8].mxu1 }
 0x219   :  { %v446_v30 = vpop.f32.mrb[9].mxu1 }
 0x21a   :  { %v770_v31 = vpop.f32.mrb[10].mxu1 }
 0x21b   :  { %v660_v32 = vpack.c.bf16 %v770_v31, %v769_v29  ;;  %v449_v33 = vpop.f32.mrb[11].mxu1 }
 0x21c   :  { %v655_v34 = vpack.c.bf16 %v449_v33, %v446_v30 }
 0x21d   :  { %676 = vst [vmem:[#allocation8 + $0x28] sm:$0xff] %v660_v32  }
 0x21e   :  { %675 = vst [vmem:[#allocation8 + $0x20] sm:$0xff] %v655_v34  }
 0x220   :  { %v773_v35 = vpop.f32.mrb[12].mxu1 }
 0x221   :  { %v462_v36 = vpop.f32.mrb[13].mxu1 }
 0x222   :  { %v774_v37 = vpop.f32.mrb[14].mxu1 }
 0x223   :  { %v670_v38 = vpack.c.bf16 %v774_v37, %v773_v35  ;;  %v465_v39 = vpop.f32.mrb[15].mxu1 }
 0x224   :  { %v665_v40 = vpack.c.bf16 %v465_v39, %v462_v36 }
 0x225   :  { %678 = vst [vmem:[#allocation8 + $0x38] sm:$0xff] %v670_v38  }
 0x226   :  { %677 = vst [vmem:[#allocation8 + $0x30] sm:$0xff] %v665_v40  }
 0x227   :  { %882 = shalt.err (!%p879_p0)
}
 0x228   :  { %s883_s6 = scalar_lea.hbm %s1004_s4, 1024 }
 0x229   :  { %p884_p1 = scmp.ne.s32.totalorder %s1004_s4, %s883_s6  ;;  %p887_p2 = scmp.lt.u32.totalorder %s883_s6, %s1004_s4 }
 0x22b   :  { %p889_p3 = pnand %p887_p2, %p884_p1 }
 0x22d   :  { %892 = shalt.err (!%p889_p3)
}
 0x22e   :  { %568 = dma.vmem_to_hbm [thread:$0]  %s563_s26, 1024, %s1004_s4, [#allocation4], %s901_s27, %s901_s27, %s902_s28  }
 0x22f   :  { %897 = dma.done.wait [#allocation4], 1024  }
 0x230   :  { %898 = vsyncadd [#allocation4], 4294966272 }
 0x231   :  { %572 = vsyncpa [#allocation3], 1 }
 0x232   :  { %573 = vsyncpa [#allocation6], 1 }
 0x233   :  { %574 = vsyncpa [#allocation4], 1 }

</bundles_post_ra>
